<compile_context>
chip_gen: v6e
topology: v6e:2x2x1
jax: 0.10.0
libtpu: 0.0.40
codegen_flags: <defaults>
</compile_context>

<pallas_src>
import jax
import jax.numpy as jnp
from jax.experimental import pallas as pl
from jax.experimental.pallas import tpu as pltpu

# ----------------------------- configuration -----------------------------
B, C, H, W = 2, 4, 16, 16        # input (NCHW like PyTorch)
K = 3                            # conv kernel size (pad=1, stride=1)
EMB_DIM = 32                     # encoder output dim (Backbone.emb_dim)
EMBEDDING_DIM = 64               # TripletModel embedding_dim
HW = H * W
CK = C * K * K                   # 36 (left un-padded in HBM)

FEAT_PAD = 128                   # lane-dense encoder feature dim
OUT_PAD = 128                    # lane-dense embedding slab (sliced in wrapper)


# ------------------------------- kernel ----------------------------------
def triplet_kernel(patches_ref, convw_ref, convb_ref, neckw_ref, neckb_ref, out_ref):
    m = patches_ref.shape[0]
    b = m // HW
    b_pad = out_ref.shape[0]

    # Backbone conv as one im2col matmul: bf16 operands, f32 accumulate (MXU).
    feat = jnp.dot(patches_ref[...], convw_ref[...],
                   preferred_element_type=jnp.float32)          # (B*HW, FEAT_PAD) f32
    # Bias + ReLU in f32 (v5e-safe elementwise path).
    feat = jnp.maximum(feat + convb_ref[...], 0.0)

    # Global average pool as a sublane reduction (no pool matrix, no extra DMA).
    # The mean's 1/HW scale is folded into the neck weight (exact, power of two).
    pooled = feat.reshape(b, HW, FEAT_PAD).sum(axis=1)          # (B, FEAT_PAD) f32

    # Sublane-pad batch rows so the output store is a full, unmasked (>=8,128) slab.
    if b_pad > b:
        pooled = jnp.concatenate(
            [pooled, jnp.zeros((b_pad - b, FEAT_PAD), jnp.float32)], axis=0)

    # Neck linear: bf16 at the MXU boundary, f32 accumulate, f32 bias.
    emb = jnp.dot(pooled.astype(jnp.bfloat16), neckw_ref[...],
                  preferred_element_type=jnp.float32) + neckb_ref[...]
    out_ref[...] = emb                                          # (B_PAD, OUT_PAD) f32


# ------------------------------- wrappers ----------------------------------
def im2col_nhwc(x_nhwc, k=K, pad=1):
    """[B,H,W,C] -> [B, H*W, k*k*C] patches, (u, v, c) order, c fastest."""
    b, h, w, c = x_nhwc.shape
    xp = jnp.pad(x_nhwc, ((0, 0), (pad, pad), (pad, pad), (0, 0)))
    cols = [xp[:, u:u + h, v:v + w, :] for u in range(k) for v in range(k)]
    patches = jnp.concatenate(cols, axis=-1)                    # (B,H,W,k*k*C)
    return patches.reshape(b, h * w, k * k * c)


def pack_params(conv_w, conv_b, neck_w, neck_b):
    """One-time packing of PyTorch-layout weights into kernel layout (hoisted).

    conv_w: (EMB_DIM, C, K, K)   conv_b: (EMB_DIM,)
    neck_w: (EMBEDDING_DIM, EMB_DIM)  -- nn.Linear (out, in)   neck_b: (EMBEDDING_DIM,)
    """
    # conv (Cout, Cin, kh, kw) -> (kh, kw, Cin, Cout) -> (CK, Cout), lane-pad Cout.
    w_mat = jnp.transpose(conv_w, (2, 3, 1, 0)).reshape(CK, EMB_DIM)
    w_mat = jnp.pad(w_mat, ((0, 0), (0, FEAT_PAD - EMB_DIM))).astype(jnp.bfloat16)
    cb = jnp.pad(conv_b, (0, FEAT_PAD - EMB_DIM)).reshape(1, FEAT_PAD).astype(jnp.float32)

    # nn.Linear (out, in) -> (in, out); fold GAP's 1/HW (power of two, exact in bf16).
    nw = jnp.transpose(neck_w) / float(HW)
    nw = jnp.pad(nw, ((0, FEAT_PAD - EMB_DIM),
                      (0, OUT_PAD - EMBEDDING_DIM))).astype(jnp.bfloat16)
    nb = jnp.pad(neck_b, (0, OUT_PAD - EMBEDDING_DIM)).reshape(1, OUT_PAD).astype(jnp.float32)
    return w_mat, cb, nw, nb


_VMEM = pl.BlockSpec(memory_space=pltpu.MemorySpace.VMEM)


@jax.jit
def triplet_forward(x_nchw, w_mat, cb, nw, nb):
    """x_nchw: [B,C,H,W] f32; weights already packed by pack_params()."""
    b = x_nchw.shape[0]
    b_pad = max(8, ((b + 7) // 8) * 8)                          # >=8 output sublanes

    x_nhwc = jnp.transpose(x_nchw, (0, 2, 3, 1))                # NCHW -> NHWC
    patches = im2col_nhwc(x_nhwc).reshape(b * HW, CK).astype(jnp.bfloat16)

    out = pl.pallas_call(
        triplet_kernel,
        out_shape=jax.ShapeDtypeStruct((b_pad, OUT_PAD), jnp.float32),
        in_specs=[_VMEM] * 5,
        out_specs=_VMEM,
    )(patches, w_mat, cb, nw, nb)

    return out[:b, :EMBEDDING_DIM]


# --------------------------------- main ------------------------------------
if __name__ == "__main__":
    key = jax.random.PRNGKey(0)
    kx, kw1, kb1, kw2, kb2 = jax.random.split(key, 5)

    x = jax.random.normal(kx, (B, C, H, W), dtype=jnp.float32)

    # Deterministic synthetic parameters in PyTorch layouts.
    conv_w = 0.1 * jax.random.normal(kw1, (EMB_DIM, C, K, K), dtype=jnp.float32)
    conv_b = 0.01 * jax.random.normal(kb1, (EMB_DIM,), dtype=jnp.float32)
    neck_w = 0.1 * jax.random.normal(kw2, (EMBEDDING_DIM, EMB_DIM), dtype=jnp.float32)
    neck_b = 0.01 * jax.random.normal(kb2, (EMBEDDING_DIM,), dtype=jnp.float32)

    packed = pack_params(conv_w, conv_b, neck_w, neck_b)        # hoisted, done once

    out = triplet_forward(x, *packed)
    out = jax.block_until_ready(out)

    assert out.shape == (B, EMBEDDING_DIM), out.shape
    assert out.dtype == jnp.float32
    assert bool(jnp.isfinite(out).all())

    print("KERNEL_OK")
</pallas_src>

<mosaic_0001>
module attributes {stable_mosaic.version = 11 : i64} {
  func.func @triplet_kernel(%arg0: memref<512x36xbf16, #tpu.memory_space<vmem>>, %arg1: memref<36x128xbf16, #tpu.memory_space<vmem>>, %arg2: memref<1x128xf32, #tpu.memory_space<vmem>>, %arg3: memref<128x128xbf16, #tpu.memory_space<vmem>>, %arg4: memref<1x128xf32, #tpu.memory_space<vmem>>, %arg5: memref<8x128xf32, #tpu.memory_space<vmem>>) attributes {dimension_semantics = [], scalar_prefetch = 0 : i64, scratch_operands = 0 : i64, tpu.core_type = #tpu.core_type<tc>} {
    %c0 = arith.constant 0 : index
    %c0_0 = arith.constant 0 : index
    %0 = vector.load %arg0[%c0, %c0_0] : memref<512x36xbf16, #tpu.memory_space<vmem>>, vector<512x36xbf16>
    %c0_1 = arith.constant 0 : index
    %c0_2 = arith.constant 0 : index
    %1 = vector.load %arg1[%c0_1, %c0_2] : memref<36x128xbf16, #tpu.memory_space<vmem>>, vector<36x128xbf16>
    %cst = arith.constant dense<0.000000e+00> : vector<512x128xf32>
    %2 = tpu.matmul %0, %1, %cst {dimension_numbers = #tpu.dot_dimension_numbers<[1], [0], [0], [1], [0, 0, 1, 1], [], []>} : vector<512x36xbf16>, vector<36x128xbf16>, vector<512x128xf32> -> vector<512x128xf32>
    %c0_3 = arith.constant 0 : index
    %c0_4 = arith.constant 0 : index
    %3 = vector.load %arg2[%c0_3, %c0_4] : memref<1x128xf32, #tpu.memory_space<vmem>>, vector<1x128xf32>
    %4 = vector.broadcast %3 : vector<1x128xf32> to vector<512x128xf32>
    %5 = arith.addf %2, %4 : vector<512x128xf32>
    %cst_5 = arith.constant 0.000000e+00 : f32
    %6 = vector.broadcast %cst_5 : f32 to vector<512x128xf32>
    %7 = arith.maximumf %5, %6 : vector<512x128xf32>
    %8 = vector.shape_cast %7 : vector<512x128xf32> to vector<2x256x128xf32>
    %cst_6 = arith.constant dense<0.000000e+00> : vector<2x128xf32>
    %9 = vector.multi_reduction <add>, %8, %cst_6 [1] : vector<2x256x128xf32> to vector<2x128xf32>
    %cst_7 = arith.constant 0.000000e+00 : f32
    %10 = vector.broadcast %cst_7 : f32 to vector<6x128xf32>
    %11 = tpu.concatenate %9, %10 in 0 : vector<2x128xf32>, vector<6x128xf32> -> vector<8x128xf32>
    %12 = arith.truncf %11 : vector<8x128xf32> to vector<8x128xbf16>
    %c0_8 = arith.constant 0 : index
    %c0_9 = arith.constant 0 : index
    %13 = vector.load %arg3[%c0_8, %c0_9] : memref<128x128xbf16, #tpu.memory_space<vmem>>, vector<128x128xbf16>
    %cst_10 = arith.constant dense<0.000000e+00> : vector<8x128xf32>
    %14 = tpu.matmul %12, %13, %cst_10 {dimension_numbers = #tpu.dot_dimension_numbers<[1], [0], [0], [1], [0, 0, 1, 1], [], []>} : vector<8x128xbf16>, vector<128x128xbf16>, vector<8x128xf32> -> vector<8x128xf32>
    %c0_11 = arith.constant 0 : index
    %c0_12 = arith.constant 0 : index
    %15 = vector.load %arg4[%c0_11, %c0_12] : memref<1x128xf32, #tpu.memory_space<vmem>>, vector<1x128xf32>
    %16 = vector.broadcast %15 : vector<1x128xf32> to vector<8x128xf32>
    %17 = arith.addf %14, %16 : vector<8x128xf32>
    %c0_13 = arith.constant 0 : index
    %c0_14 = arith.constant 0 : index
    %18 = vector.load %arg5[%c0_13, %c0_14] : memref<8x128xf32, #tpu.memory_space<vmem>>, vector<8x128xf32>
    tpu.vector_store %arg5[%c0_13, %c0_14], %17 {strides = array<i32>} : memref<8x128xf32, #tpu.memory_space<vmem>>, vector<8x128xf32>,
    return
  }
}

</mosaic_0001>

<bundles_post_ra>
// kernel: triplet_forward.1
= control target key start
LH: loop header
LB: loop body
LE: loop exit
PB: predicated region body
PF: predicated region fallthrough
CT: control target
= control target key end

     0   :  { %vm369_vm0 = vcmask 1041408   ;;  %vm272_vm1 = vcmask 293888   ;;  %v1190_v36 = vmov 0.0   ;;  %vm1191_vm2 = vmmov 0   ;;  %s1515_s1 = inlined_call_operand.vmem [shape: bf16[36,128], index: 1, kind: input, shape index: {}]   ;;  %s1516_s0 = inlined_call_operand.vmem [shape: bf16[512,36], index: 0, kind: input, shape index: {}]   ;;  %s1517_s3 = inlined_call_operand.vmem [shape: bf16[128,128], index: 3, kind: input, shape index: {}]   ;;  %s1518_s2 = inlined_call_operand.vmem [shape: f32[1,128], index: 2, kind: input, shape index: {}]   ;;  %s1519_s4 = inlined_call_operand.vmem [shape: f32[1,128], index: 4, kind: input, shape index: {}]   ;;  %s1520_s5 = inlined_call_operand.vmem [shape: f32[8,128], index: 5, kind: output, shape index: {}]  }
   0x1   :  { %v1147_v0 = vld [vmem:[%s1515_s1 + $0x10] ss:$0 sps:$4 sm:$0x33]   ;;  %v1148_v1 = vld [vmem:[%s1515_s1 + $0x8] sm:$0xff]   ;;  %v1150_v3 = vld [vmem:[%s1516_s0] sm:$0xff]   ;;  %vm802_vm3 = vcmask 1041409  }
   0x2   :  { %1143 = vmatprep.subr.msk.bf16.mxu0 %vm369_vm0, %v1147_v0  ;;  %v371_v2 = vsel %vm369_vm0, %v1147_v0, 0  ;;  %1144 = vmatprep.subr.msk.bf16.mxu1 %vm369_vm0, %v1147_v0  ;;  %v1149_v4 = vld [vmem:[%s1515_s1] sm:$0xff]   ;;  %v1151_v5 = vld [vmem:[%s1516_s0 + $0x8] sm:$0xff]   ;;  %v1152_v6 = vld [vmem:[%s1516_s0 + $0x10] sm:$0xff]  }
   0x3   :  { %1048 = vmatpush3.bf16.msra.mxu0 %v371_v2  ;;  %1140 = vmatpush3.bf16.msra.mxu1 %v371_v2  ;;  %v1153_v7 = vld [vmem:[%s1516_s0 + $0x18] sm:$0xff]   ;;  %v1154_v8 = vld [vmem:[%s1516_s0 + $0x20] sm:$0xff]   ;;  %v1168_v9 = vld [vmem:[%s1516_s0 + $0x90] sm:$0xff]  }
   0x4   :  { %1049 = vmatprep.subr.bf16.mxu0 %v1148_v1  ;;  %1138 = vmatprep.subr.bf16.mxu1 %v1148_v1  ;;  %v1169_v10 = vld [vmem:[%s1516_s0 + $0x98] sm:$0xff]   ;;  %v1170_v11 = vld [vmem:[%s1516_s0 + $0xa0] sm:$0xff]   ;;  %v1155_v12 = vld [vmem:[%s1516_s0 + $0x28] sm:$0xff]  }
   0x5   :  { %1053 = vmatprep.mubr.msk.bf16.mxu0 %vm272_vm1, %v1150_v3  ;;  %1089 = vmatprep.mubr.msk.bf16.mxu1 %vm272_vm1, %v1168_v9  ;;  %v1156_v13 = vld [vmem:[%s1516_s0 + $0x30] sm:$0xff]   ;;  %v1171_v14 = vld [vmem:[%s1516_s0 + $0xa8] sm:$0xff]   ;;  %v1157_v16 = vld [vmem:[%s1516_s0 + $0x38] sm:$0xff]  }
   0x6   :  { %v1172_v15 = vld [vmem:[%s1516_s0 + $0xb0] sm:$0xff]   ;;  %v1158_v17 = vld [vmem:[%s1516_s0 + $0x40] sm:$0xff]   ;;  %v1173_v18 = vld [vmem:[%s1516_s0 + $0xb8] sm:$0xff]  }
   0x7   :  { %1050 = vmatpush3.bf16.msra.mxu0 %v1148_v1  ;;  %1141 = vmatpush3.bf16.msra.mxu1 %v1148_v1  ;;  %v1174_v19 = vld [vmem:[%s1516_s0 + $0xc0] sm:$0xff]   ;;  %v1159_v20 = vld [vmem:[%s1516_s0 + $0x48] sm:$0xff]   ;;  %v1160_v21 = vld [vmem:[%s1516_s0 + $0x50] sm:$0xff]  }
   0x8   :  { %1051 = vmatprep.subr.bf16.mxu0 %v1149_v4  ;;  %1139 = vmatprep.subr.bf16.mxu1 %v1149_v4  ;;  %v1175_v22 = vld [vmem:[%s1516_s0 + $0xc8] sm:$0xff]   ;;  %v1176_v23 = vld [vmem:[%s1516_s0 + $0xd0] sm:$0xff]   ;;  %v1161_v24 = vld [vmem:[%s1516_s0 + $0x58] sm:$0xff]  }
   0x9   :  { %v1162_v25 = vld [vmem:[%s1516_s0 + $0x60] sm:$0xff]   ;;  %v1177_v26 = vld [vmem:[%s1516_s0 + $0xd8] sm:$0xff]   ;;  %v1163_v28 = vld [vmem:[%s1516_s0 + $0x68] sm:$0xff]  }
   0xa   :  { %v1178_v27 = vld [vmem:[%s1516_s0 + $0xe0] sm:$0xff]   ;;  %v1164_v29 = vld [vmem:[%s1516_s0 + $0x70] sm:$0xff]   ;;  %v1179_v30 = vld [vmem:[%s1516_s0 + $0xe8] sm:$0xff]  }
   0xb   :  { %1052 = vmatpush3.bf16.msra.mxu0 %v1149_v4  ;;  %1142 = vmatpush3.bf16.msra.mxu1 %v1149_v4  ;;  %v1180_v31 = vld [vmem:[%s1516_s0 + $0xf0] sm:$0xff]   ;;  %v1165_v32 = vld [vmem:[%s1516_s0 + $0x78] sm:$0xff]   ;;  %v1166_v33 = vld [vmem:[%s1516_s0 + $0x80] sm:$0xff]  }
   0xc   :  { %v1181_v34 = vld [vmem:[%s1516_s0 + $0xf8] sm:$0xff]   ;;  %v1167_v35 = vld [vmem:[%s1516_s0 + $0x88] sm:$0xff]   ;;  %1117 = vmatprep.subr.bf16.mxu1 %v1190_v36  ;;  %v1183_v38 = vld [vmem:[%s1517_s3 + $0x30] sm:$0xff]  }
   0xd   :  { %v1182_v37 = vld [vmem:[%s1517_s3 + $0x38] sm:$0xff]   ;;  %v1184_v39 = vld [vmem:[%s1517_s3 + $0x28] sm:$0xff]   ;;  %v1185_v41 = vld [vmem:[%s1517_s3 + $0x20] sm:$0xff]  }
   0xe   :  { %1054 = vmatmul.mubr.msk.bf16.vlgmr.msra.gmra.mxu0 %vm272_vm1, %v1151_v5  ;;  %1090 = vmatmul.mubr.msk.bf16.vlgmr.msra.gmra.mxu1 %vm272_vm1, %v1169_v10  ;;  %v1381_v43 = vld [vmem:[%s1518_s2] ss:$0 sm:$0xff]  ;;  %v1186_v49 = vld [vmem:[%s1517_s3 + $0x18] sm:$0xff]   ;;  %v1187_v58 = vld [vmem:[%s1517_s3 + $0x10] sm:$0xff]  }
   0xf   :  { %1057 = vmatprep.mubr.msk.bf16.mxu0 %vm272_vm1, %v1152_v6  ;;  %1093 = vmatprep.mubr.msk.bf16.mxu1 %vm272_vm1, %v1170_v11  ;;  %v1188_v4 = vld [vmem:[%s1517_s3 + $0x8] sm:$0xff]   ;;  %vm1000_vm4 = vmpackc.low %vm369_vm0, %vm369_vm0 }
  0x10   :  { %1118 = vmatpush3.bf16.msra.mxu1 %v1182_v37 }
  0x11   :  { %1119 = vmatprep.subr.bf16.mxu1 %v1190_v36 }
  0x14   :  { %1120 = vmatpush3.bf16.msra.mxu1 %v1183_v38 }
  0x15   :  { %1121 = vmatprep.subr.bf16.mxu1 %v1190_v36 }
  0x16   :  { %1058 = vmatmul.mubr.msk.bf16.gmra.mxu0 %vm272_vm1, %v1153_v7  ;;  %1094 = vmatmul.mubr.msk.bf16.gmra.mxu1 %vm272_vm1, %v1171_v14  ;;  %v1189_v14 = vld [vmem:[%s1517_s3] sm:$0xff]  }
  0x17   :  { %1061 = vmatprep.mubr.msk.bf16.mxu0 %vm272_vm1, %v1154_v8  ;;  %1097 = vmatprep.mubr.msk.bf16.mxu1 %vm272_vm1, %v1172_v15 }
  0x18   :  { %1122 = vmatpush3.bf16.msra.mxu1 %v1184_v39 }
  0x19   :  { %1123 = vmatprep.subr.bf16.mxu1 %v1190_v36 }
  0x1c   :  { %1124 = vmatpush3.bf16.msra.mxu1 %v1185_v41 }
  0x1d   :  { %1125 = vmatprep.subr.bf16.mxu1 %v1190_v36 }
  0x1e   :  { %1062 = vmatmul.mubr.msk.bf16.gmra.mxu0 %vm272_vm1, %v1155_v12  ;;  %1098 = vmatmul.mubr.msk.bf16.gmra.mxu1 %vm272_vm1, %v1173_v18 }
  0x1f   :  { %1065 = vmatprep.mubr.msk.bf16.mxu0 %vm272_vm1, %v1156_v13  ;;  %1101 = vmatprep.mubr.msk.bf16.mxu1 %vm272_vm1, %v1174_v19 }
  0x20   :  { %1126 = vmatpush3.bf16.msra.mxu1 %v1186_v49 }
  0x21   :  { %1127 = vmatprep.subr.bf16.mxu1 %v1190_v36 }
  0x24   :  { %1128 = vmatpush3.bf16.msra.mxu1 %v1187_v58 }
  0x25   :  { %1129 = vmatprep.subr.bf16.mxu1 %v1190_v36 }
  0x26   :  { %1066 = vmatmul.mubr.msk.bf16.gmra.mxu0 %vm272_vm1, %v1157_v16  ;;  %1102 = vmatmul.mubr.msk.bf16.gmra.mxu1 %vm272_vm1, %v1175_v22 }
  0x27   :  { %1069 = vmatprep.mubr.msk.bf16.mxu0 %vm272_vm1, %v1158_v17  ;;  %1105 = vmatprep.mubr.msk.bf16.mxu1 %vm272_vm1, %v1176_v23 }
  0x28   :  { %1130 = vmatpush3.bf16.msra.mxu1 %v1188_v4 }
  0x29   :  { %1131 = vmatprep.subr.bf16.mxu1 %v1190_v36 }
  0x2c   :  { %1132 = vmatpush3.bf16.msra.mxu1 %v1189_v14 }
  0x2e   :  { %1070 = vmatmul.mubr.msk.bf16.gmra.mxu0 %vm272_vm1, %v1159_v20  ;;  %1106 = vmatmul.mubr.msk.bf16.gmra.mxu1 %vm272_vm1, %v1177_v26 }
  0x2f   :  { %1073 = vmatprep.mubr.msk.bf16.mxu0 %vm272_vm1, %v1160_v21  ;;  %1109 = vmatprep.mubr.msk.bf16.mxu1 %vm272_vm1, %v1178_v27 }
  0x36   :  { %1074 = vmatmul.mubr.msk.bf16.gmra.mxu0 %vm272_vm1, %v1161_v24  ;;  %1110 = vmatmul.mubr.msk.bf16.gmra.mxu1 %vm272_vm1, %v1179_v30 }
  0x37   :  { %1077 = vmatprep.mubr.msk.bf16.mxu0 %vm272_vm1, %v1162_v25  ;;  %1113 = vmatprep.mubr.msk.bf16.mxu1 %vm272_vm1, %v1180_v31 }
  0x3e   :  { %1078 = vmatmul.mubr.msk.bf16.gmra.mxu0 %vm272_vm1, %v1163_v28  ;;  %1114 = vmatmul.mubr.msk.bf16.gmra.mxu1 %vm272_vm1, %v1181_v34 }
  0x3f   :  { %1081 = vmatprep.mubr.msk.bf16.mxu0 %vm272_vm1, %v1164_v29  ;;  %1133 = vmatprep.mubr.msk.bf16.mxu1 %vm1191_vm2, %v1190_v36 }
  0x46   :  { %1082 = vmatmul.mubr.msk.bf16.gmra.mxu0 %vm272_vm1, %v1165_v32 }
  0x47   :  { %1085 = vmatprep.mubr.msk.bf16.mxu0 %vm272_vm1, %v1166_v33 }
  0x4e   :  { %1086 = vmatmul.mubr.msk.bf16.gmra.mxu0 %vm272_vm1, %v1167_v35 }
  0xce   :  { %v1055_v40 = vpop.f32.mrf.mxu0  ;;  %v1396_v63 = vpop.f32.mrf.mxu1 }
  0xcf   :  { %v416_v47 = vadd.f32 %v1055_v40, %v1381_v43 }
  0xd0   :  { %v407_v42 = vpop.f32.mrf.mxu0  ;;  %v1405_v10 = vpop.f32.mrf.mxu1 }
  0xd1   :  { %v408_v45 = vadd.f32 %v1381_v43, %v407_v42  ;;  %v664_v55 = vmax.f32 %v416_v47, 0.0 }
  0xd2   :  { %v1056_v44 = vpop.f32.mrf.mxu0  ;;  %v1412_v19 = vpop.f32.mrf.mxu1 }
  0xd3   :  { %v662_v51 = vmax.f32 %v408_v45, 0.0  ;;  %v419_v52 = vadd.f32 %v1056_v44, %v1381_v43 }
  0xd4   :  { %v410_v46 = vpop.f32.mrf.mxu0  ;;  %v1418_v29 = vpop.f32.mrf.mxu1 }
  0xd5   :  { %v411_v48 = vadd.f32 %v1381_v43, %v410_v46  ;;  %v665_v60 = vmax.f32 %v419_v52, 0.0 }
  0xd6   :  { %v1059_v50 = vpop.f32.mrf.mxu0  ;;  %v1421_v38 = vpop.f32.mrf.mxu1 }
  0xd7   :  { %v663_v53 = vmax.f32 %v411_v48, 0.0  ;;  %v432_v0 = vadd.f32 %v1059_v50, %v1381_v43 }
  0xd8   :  { %v423_v54 = vpop.f32.mrf.mxu0  ;;  %v1426_v48 = vpop.f32.mrf.mxu1 }
  0xd9   :  { %v726_v56 = vadd.f32 %v663_v53, %v662_v51  ;;  %v424_v57 = vadd.f32 %v1381_v43, %v423_v54  ;;  %v668_v11 = vmax.f32 %v432_v0, 0.0 }
  0xda   :  { %v1060_v59 = vpop.f32.mrf.mxu0 }
  0xdb   :  { %v727_v61 = vadd.f32 %v726_v56, %v664_v55  ;;  %v666_v1 = vmax.f32 %v424_v57, 0.0  ;;  %v435_v7 = vadd.f32 %v1060_v59, %v1381_v43  ;;  %v1429_v56 = vpop.f32.mrf.mxu1 }
  0xdc   :  { %v426_v62 = vpop.f32.mrf.mxu0 }
  0xdd   :  { %v728_v2 = vadd.f32 %v727_v61, %v665_v60  ;;  %v427_v3 = vadd.f32 %v1381_v43, %v426_v62  ;;  %v669_v16 = vmax.f32 %v435_v7, 0.0 }
  0xde   :  { %v1063_v5 = vpop.f32.mrf.mxu0 }
  0xdf   :  { %v729_v6 = vadd.f32 %v728_v2, %v666_v1  ;;  %v667_v8 = vmax.f32 %v427_v3, 0.0  ;;  %v448_v20 = vadd.f32 %v1063_v5, %v1381_v43  ;;  %v1434_v3 = vpop.f32.mrf.mxu1 }
  0xe0   :  { %v439_v9 = vpop.f32.mrf.mxu0 }
  0xe1   :  { %v730_v12 = vadd.f32 %v729_v6, %v667_v8  ;;  %v440_v13 = vadd.f32 %v1381_v43, %v439_v9  ;;  %v672_v30 = vmax.f32 %v448_v20, 0.0 }
  0xe2   :  { %v1064_v15 = vpop.f32.mrf.mxu0 }
  0xe3   :  { %v731_v17 = vadd.f32 %v730_v12, %v668_v11  ;;  %v670_v21 = vmax.f32 %v440_v13, 0.0  ;;  %v451_v26 = vadd.f32 %v1064_v15, %v1381_v43  ;;  %v1437_v12 = vpop.f32.mrf.mxu1 }
  0xe4   :  { %v442_v18 = vpop.f32.mrf.mxu0 }
  0xe5   :  { %v732_v22 = vadd.f32 %v731_v17, %v669_v16  ;;  %v443_v23 = vadd.f32 %v1381_v43, %v442_v18  ;;  %v673_v34 = vmax.f32 %v451_v26, 0.0 }
  0xe6   :  { %v1067_v24 = vpop.f32.mrf.mxu0 }
  0xe7   :  { %v733_v25 = vadd.f32 %v732_v22, %v670_v21  ;;  %v671_v27 = vmax.f32 %v443_v23, 0.0  ;;  %v464_v36 = vadd.f32 %v1067_v24, %v1381_v43  ;;  %v1442_v23 = vpop.f32.mrf.mxu1 }
  0xe8   :  { %v455_v28 = vpop.f32.mrf.mxu0 }
  0xe9   :  { %v734_v31 = vadd.f32 %v733_v25, %v671_v27  ;;  %v456_v32 = vadd.f32 %v1381_v43, %v455_v28  ;;  %v676_v49 = vmax.f32 %v464_v36, 0.0 }
  0xea   :  { %v1068_v33 = vpop.f32.mrf.mxu0 }
  0xeb   :  { %v735_v35 = vadd.f32 %v734_v31, %v672_v30  ;;  %v674_v39 = vmax.f32 %v456_v32, 0.0  ;;  %v467_v45 = vadd.f32 %v1068_v33, %v1381_v43  ;;  %v1445_v32 = vpop.f32.mrf.mxu1 }
  0xec   :  { %v458_v37 = vpop.f32.mrf.mxu0 }
  0xed   :  { %v736_v40 = vadd.f32 %v735_v35, %v673_v34  ;;  %v459_v41 = vadd.f32 %v1381_v43, %v458_v37  ;;  %v677_v53 = vmax.f32 %v467_v45, 0.0 }
  0xee   :  { %v1071_v42 = vpop.f32.mrf.mxu0 }
  0xef   :  { %v737_v44 = vadd.f32 %v736_v40, %v674_v39  ;;  %v675_v46 = vmax.f32 %v459_v41, 0.0  ;;  %v480_v57 = vadd.f32 %v1071_v42, %v1381_v43 }
  0xf0   :  { %v471_v47 = vpop.f32.mrf.mxu0 }
  0xf1   :  { %v738_v50 = vadd.f32 %v737_v44, %v675_v46  ;;  %v472_v51 = vadd.f32 %v1381_v43, %v471_v47  ;;  %v680_v4 = vmax.f32 %v480_v57, 0.0  ;;  %v1450_v44 = vpop.f32.mrf.mxu1 }
  0xf2   :  { %v1072_v52 = vpop.f32.mrf.mxu0 }
  0xf3   :  { %v739_v54 = vadd.f32 %v738_v50, %v676_v49  ;;  %v678_v58 = vmax.f32 %v472_v51, 0.0  ;;  %v483_v0 = vadd.f32 %v1072_v52, %v1381_v43 }
  0xf4   :  { %v474_v55 = vpop.f32.mrf.mxu0 }
  0xf5   :  { %v740_v59 = vadd.f32 %v739_v54, %v677_v53  ;;  %v475_v60 = vadd.f32 %v1381_v43, %v474_v55  ;;  %v681_v8 = vmax.f32 %v483_v0, 0.0  ;;  %v1453_v53 = vpop.f32.mrf.mxu1 }
  0xf6   :  { %v1075_v61 = vpop.f32.mrf.mxu0 }
  0xf7   :  { %v741_v62 = vadd.f32 %v740_v59, %v678_v58  ;;  %v679_v1 = vmax.f32 %v475_v60, 0.0  ;;  %v496_v13 = vadd.f32 %v1075_v61, %v1381_v43 }
  0xf8   :  { %v487_v2 = vpop.f32.mrf.mxu0 }
  0xf9   :  { %v742_v5 = vadd.f32 %v741_v62, %v679_v1  ;;  %v488_v6 = vadd.f32 %v1381_v43, %v487_v2  ;;  %v684_v24 = vmax.f32 %v496_v13, 0.0  ;;  %v599_v1 = vpop.f32.mrf.mxu1 }
  0xfa   :  { %v1076_v7 = vpop.f32.mrf.mxu0 }
  0xfb   :  { %v743_v9 = vadd.f32 %v742_v5, %v680_v4  ;;  %v682_v14 = vmax.f32 %v488_v6, 0.0  ;;  %v499_v20 = vadd.f32 %v1076_v7, %v1381_v43 }
  0xfc   :  { %v490_v11 = vpop.f32.mrf.mxu0 }
  0xfd   :  { %v744_v15 = vadd.f32 %v743_v9, %v681_v8  ;;  %v491_v16 = vadd.f32 %v1381_v43, %v490_v11  ;;  %v685_v28 = vmax.f32 %v499_v20, 0.0  ;;  %v1104_v11 = vpop.f32.mrf.mxu1 }
  0xfe   :  { %v1079_v17 = vpop.f32.mrf.mxu0 }
  0xff   :  { %v745_v18 = vadd.f32 %v744_v15, %v682_v14  ;;  %v683_v21 = vmax.f32 %v491_v16, 0.0  ;;  %v512_v33 = vadd.f32 %v1079_v17, %v1381_v43  ;;  %v602_v20 = vpop.f32.mrf.mxu1 }
 0x100   :  { %v503_v22 = vpop.f32.mrf.mxu0 }
 0x101   :  { %v746_v25 = vadd.f32 %v745_v18, %v683_v21  ;;  %v504_v26 = vadd.f32 %v1381_v43, %v503_v22  ;;  %v688_v45 = vmax.f32 %v512_v33, 0.0  ;;  %v552_v22 = vadd.f32 %v1381_v43, %v1405_v10 }
 0x102   :  { %v1080_v27 = vpop.f32.mrf.mxu0 }
 0x103   :  { %v747_v30 = vadd.f32 %v746_v25, %v684_v24  ;;  %v686_v34 = vmax.f32 %v504_v26, 0.0  ;;  %v515_v40 = vadd.f32 %v1080_v27, %v1381_v43  ;;  %v555_v27 = vadd.f32 %v1381_v43, %v1418_v29 }
 0x104   :  { %v506_v31 = vpop.f32.mrf.mxu0  ;;  %v571_v29 = vadd.f32 %v1381_v43, %v1434_v3  ;;  %v587_v3 = vadd.f32 %v1381_v43, %v1450_v44  ;;  %v603_v44 = vadd.f32 %v1381_v43, %v602_v20 }
 0x105   :  { %v748_v35 = vadd.f32 %v747_v30, %v685_v28  ;;  %v507_v37 = vadd.f32 %v1381_v43, %v506_v31  ;;  %v689_v50 = vmax.f32 %v515_v40, 0.0  ;;  %v1107_v28 = vpop.f32.mrf.mxu1  ;;  %v560_v30 = vadd.f32 %v1396_v63, %v1381_v43 }
 0x106   :  { %v1083_v36 = vpop.f32.mrf.mxu0  ;;  %v698_v31 = vmax.f32 %v552_v22, 0.0  ;;  %v568_v40 = vadd.f32 %v1381_v43, %v1426_v48  ;;  %v576_v63 = vadd.f32 %v1421_v38, %v1381_v43  ;;  %v584_v48 = vadd.f32 %v1381_v43, %v1442_v23 }
 0x107   :  { %v749_v39 = vadd.f32 %v748_v35, %v686_v34  ;;  %v687_v41 = vmax.f32 %v507_v37, 0.0  ;;  %v528_v54 = vadd.f32 %v1083_v36, %v1381_v43  ;;  %v563_v34 = vadd.f32 %v1412_v19, %v1381_v43  ;;  %v615_v36 = vpop.f32.mrf.mxu1 }
 0x108   :  { %v519_v42 = vpop.f32.mrf.mxu0  ;;  %v699_v35 = vmax.f32 %v555_v27, 0.0  ;;  %v592_v38 = vadd.f32 %v1437_v12, %v1381_v43  ;;  %v600_v23 = vadd.f32 %v1381_v43, %v599_v1  ;;  %v608_v12 = vadd.f32 %v1453_v53, %v1381_v43 }
 0x109   :  { %v750_v46 = vadd.f32 %v749_v39, %v687_v41  ;;  %v520_v47 = vadd.f32 %v1381_v43, %v519_v42  ;;  %v692_v2 = vmax.f32 %v528_v54, 0.0  ;;  %v700_v39 = vmax.f32 %v560_v30, 0.0 }
 0x10a   :  { %v1084_v49 = vpop.f32.mrf.mxu0  ;;  %v701_v41 = vmax.f32 %v563_v34, 0.0 }
 0x10b   :  { %v751_v51 = vadd.f32 %v750_v46, %v688_v45  ;;  %v690_v55 = vmax.f32 %v520_v47, 0.0  ;;  %v531_v61 = vadd.f32 %v1084_v49, %v1381_v43  ;;  %v1108_v45 = vpop.f32.mrf.mxu1  ;;  %v702_v46 = vmax.f32 %v568_v40, 0.0 }
 0x10c   :  { %v522_v52 = vpop.f32.mrf.mxu0  ;;  %v579_v49 = vadd.f32 %v1429_v56, %v1381_v43  ;;  %v595_v56 = vadd.f32 %v1445_v32, %v1381_v43  ;;  %v711_v32 = vmax.f32 %v603_v44, 0.0  ;;  %v627_v30 = vadd.f32 %v1108_v45, %v1381_v43 }
 0x10d   :  { %v752_v57 = vadd.f32 %v751_v51, %v689_v50  ;;  %v523_v58 = vadd.f32 %v1381_v43, %v522_v52  ;;  %v693_v6 = vmax.f32 %v531_v61, 0.0  ;;  %v703_v50 = vmax.f32 %v571_v29, 0.0  ;;  %v618_v51 = vpop.f32.mrf.mxu1 }
 0x10e   :  { %v1087_v59 = vpop.f32.mrf.mxu0  ;;  %v704_v52 = vmax.f32 %v576_v63, 0.0 }
 0x10f   :  { %v753_v60 = vadd.f32 %v752_v57, %v690_v55  ;;  %v691_v62 = vmax.f32 %v523_v58, 0.0  ;;  %v544_v14 = vadd.f32 %v1087_v59, %v1381_v43  ;;  %v705_v55 = vmax.f32 %v579_v49, 0.0  ;;  %v1111_v58 = vpop.f32.mrf.mxu1 }
 0x110   :  { %v535_v0 = vpop.f32.mrf.mxu0  ;;  %v706_v59 = vmax.f32 %v584_v48, 0.0  ;;  %v640_v40 = vadd.f32 %v1111_v58, %v1381_v43 }
 0x111   :  { %v754_v4 = vadd.f32 %v753_v60, %v691_v62  ;;  %v536_v8 = vadd.f32 %v1381_v43, %v535_v0  ;;  %v696_v21 = vmax.f32 %v544_v14, 0.0  ;;  %v707_v62 = vmax.f32 %v587_v3, 0.0  ;;  %v631_v0 = vpop.f32.mrf.mxu1 }
 0x112   :  { %v1088_v5 = vpop.f32.mrf.mxu0 }
 0x113   :  { %v755_v7 = vadd.f32 %v754_v4, %v692_v2  ;;  %v694_v16 = vmax.f32 %v536_v8, 0.0  ;;  %v547_v17 = vadd.f32 %v1088_v5, %v1381_v43  ;;  %v708_v2 = vmax.f32 %v592_v38, 0.0 }
 0x114   :  { %v538_v9 = vpop.f32.mrf.mxu0  ;;  %v709_v5 = vmax.f32 %v595_v56, 0.0  ;;  %v710_v8 = vmax.f32 %v600_v23, 0.0 }
 0x115   :  { %v1459_v13 = vadd.f32 %v755_v7, %v693_v6  ;;  %v539_v15 = vadd.f32 %v1381_v43, %v538_v9  ;;  %v697_v25 = vmax.f32 %v547_v17, 0.0  ;;  %v1112_v7 = vpop.f32.mrf.mxu1  ;;  %v712_v17 = vmax.f32 %v608_v12, 0.0 }
 0x116   :  { %v643_v29 = vadd.f32 %v1112_v7, %v1381_v43 }
 0x117   :  { %v695_v18 = vmax.f32 %v539_v15, 0.0  ;;  %v611_v15 = vadd.f32 %v1104_v11, %v1381_v43 }
 0x118   :  { %v721_v49 = vmax.f32 %v643_v29, 0.0 }
 0x119   :  { %v763_v24 = vadd.f32 %v695_v18, %v694_v16  ;;  %v634_v16 = vpop.f32.mrf.mxu1  ;;  %v713_v1 = vmax.f32 %v611_v15, 0.0 }
 0x11b   :  { %v764_v26 = vadd.f32 %v763_v24, %v696_v21  ;;  %v616_v21 = vadd.f32 %v1381_v43, %v615_v36  ;;  %v619_v24 = vadd.f32 %v1381_v43, %v618_v51  ;;  %v1115_v20 = vpop.f32.mrf.mxu1 }
 0x11d   :  { %v765_v33 = vadd.f32 %v764_v26, %v697_v25  ;;  %v624_v25 = vadd.f32 %v1107_v28, %v1381_v43  ;;  %v714_v26 = vmax.f32 %v616_v21, 0.0  ;;  %v647_v11 = vpop.f32.mrf.mxu1 }
 0x11f   :  { %v766_v37 = vadd.f32 %v765_v33, %v698_v31  ;;  %v715_v31 = vmax.f32 %v619_v24, 0.0  ;;  %v716_v33 = vmax.f32 %v624_v25, 0.0 }
 0x121   :  { %v767_v10 = vadd.f32 %v766_v37, %v699_v35  ;;  %v632_v35 = vadd.f32 %v1381_v43, %v631_v0  ;;  %v717_v37 = vmax.f32 %v627_v30, 0.0 }
 0x123   :  { %v768_v42 = vadd.f32 %v767_v10, %v700_v39  ;;  %v635_v39 = vadd.f32 %v1381_v43, %v634_v16  ;;  %v1116_v10 = vpop.f32.mrf.mxu1 }
 0x124   :  { %v659_v3 = vadd.f32 %v1116_v10, %v1381_v43 }
 0x125   :  { %v769_v47 = vadd.f32 %v768_v42, %v701_v41  ;;  %v718_v41 = vmax.f32 %v632_v35, 0.0  ;;  %v719_v63 = vmax.f32 %v635_v39, 0.0  ;;  %v650_v45 = vpop.f32.mrf.mxu1 }
 0x126   :  { %v651_v51 = vadd.f32 %v1381_v43, %v650_v45 }
 0x127   :  { %v770_v19 = vadd.f32 %v769_v47, %v702_v46  ;;  %v720_v46 = vmax.f32 %v640_v40, 0.0 }
 0x128   :  { %v723_v58 = vmax.f32 %v651_v51, 0.0 }
 0x129   :  { %v771_v54 = vadd.f32 %v770_v19, %v703_v50  ;;  %v648_v19 = vadd.f32 %v1381_v43, %v647_v11 }
 0x12b   :  { %v772_v57 = vadd.f32 %v771_v54, %v704_v52  ;;  %v757_v52 = vrot.slane %v1459_v13, 4  ;;  %v656_v54 = vadd.f32 %v1115_v20, %v1381_v43  ;;  %v722_v48 = vmax.f32 %v648_v19, 0.0 }
 0x12d   :  { %v773_v60 = vadd.f32 %v772_v57, %v705_v55  ;;  %v758_v38 = vadd.f32 %v757_v52, %v1459_v13 }
 0x12f   :  { %v774_v61 = vadd.f32 %v773_v60, %v706_v59  ;;  %v724_v59 = vmax.f32 %v656_v54, 0.0 }
 0x131   :  { %v775_v4 = vadd.f32 %v774_v61, %v707_v62  ;;  %v725_v61 = vmax.f32 %v659_v3, 0.0  ;;  %v759_v62 = vrot.slane %v758_v38, 2 }
 0x133   :  { %v776_v6 = vadd.f32 %v775_v4, %v708_v2  ;;  %v760_v4 = vadd.f32 %v759_v62, %v758_v38 }
 0x135   :  { %v777_v9 = vadd.f32 %v776_v6, %v709_v5  ;;  %v761_v6 = vrot.slane %v760_v4, 1 }
 0x137   :  { %v778_v14 = vadd.f32 %v777_v9, %v710_v8  ;;  %v762_v12 = vadd.f32 %v761_v6, %v760_v4  ;;  %v991_v9 = vld [vmem:[%s1519_s4] ss:$0 sm:$0xff] }
 0x139   :  { %v779_v18 = vadd.f32 %v778_v14, %v711_v32 }
 0x13b   :  { %v780_v22 = vadd.f32 %v779_v18, %v712_v17 }
 0x13d   :  { %v781_v53 = vadd.f32 %v780_v22, %v713_v1 }
 0x13f   :  { %v782_v27 = vadd.f32 %v781_v53, %v714_v26 }
 0x141   :  { %v783_v34 = vadd.f32 %v782_v27, %v715_v31 }
 0x143   :  { %v784_v36 = vadd.f32 %v783_v34, %v716_v33 }
 0x145   :  { %v785_v28 = vadd.f32 %v784_v36, %v717_v37 }
 0x147   :  { %v786_v42 = vadd.f32 %v785_v28, %v718_v41 }
 0x149   :  { %v787_v47 = vadd.f32 %v786_v42, %v719_v63 }
 0x14b   :  { %v788_v50 = vadd.f32 %v787_v47, %v720_v46 }
 0x14d   :  { %v789_v55 = vadd.f32 %v788_v50, %v721_v49 }
 0x14f   :  { %v790_v57 = vadd.f32 %v789_v55, %v722_v48 }
 0x151   :  { %v791_v60 = vadd.f32 %v790_v57, %v723_v58 }
 0x153   :  { %v792_v56 = vadd.f32 %v791_v60, %v724_v59 }
 0x155   :  { %v793_v0 = vadd.f32 %v792_v56, %v725_v61 }
 0x157   :  { %v794_v2 = vrot.slane %v793_v0, 4 }
 0x159   :  { %v795_v23 = vadd.f32 %v794_v2, %v793_v0 }
 0x15b   :  { %v796_v5 = vrot.slane %v795_v23, 2 }
 0x15d   :  { %v797_v44 = vadd.f32 %v796_v5, %v795_v23 }
 0x15f   :  { %v798_v7 = vrot.slane %v797_v44, 1 }
 0x161   :  { %v799_v8 = vadd.f32 %v798_v7, %v797_v44 }
 0x163   :  { %v803_v43 = vsel %vm802_vm3, %v799_v8, %v762_v12 }
 0x164   :  { %v1001_v13 = vpack.c.bf16 %v803_v43, %v803_v43 }
 0x166   :  { %1134 = vmatmul.mubr.msk.bf16.vlgmr.msra.gmra.mxu1 %vm1000_vm4, %v1001_v13 }
 0x226   :  { %v912_v14 = vpop.f32.mrf.mxu1 }
 0x227   :  { %v913_v15 = vadd.f32 %v991_v9, %v912_v14 }
 0x228   :  { %v1135_v32 = vpop.f32.mrf.mxu1 }
 0x229   :  { %918 = vst [vmem:[%s1520_s5] sm:$0xff] %v913_v15 }
 0x22a   :  { %v915_v16 = vpop.f32.mrf.mxu1 }
 0x22c   :  { %v1136_v17 = vpop.f32.mrf.mxu1 }

</bundles_post_ra>
